<compile_context>
chip_gen: v7x
topology: tpu7x:2x2x1
jax: 0.10.0
libtpu: 0.0.40
codegen_flags: <defaults>
</compile_context>

<pallas_src>
import functools

import jax
import jax.numpy as jnp
from jax.experimental import pallas as pl
from jax.experimental.pallas import tpu as pltpu


def _pool_kernel(ids_ref, emb_ref, part_ref, *, n_nodes):
    """One node-tile step of the streaming segment-sum (mean-pool numerator).

    ids_ref  : (1, TILE_N) int32   graph id per node (tail lanes may be garbage -> masked)
    emb_ref  : (TILE_N, D) float   node-embedding tile (bf16 or f32, streamed as-is)
    part_ref : (B_pad, D)  float32 per-slice partial segment sum (output block, resident
                                   across the j axis -> init / accumulate pattern)
    """
    s = pl.program_id(0)                      # slice (TensorCore) index  -- "parallel"
    j = pl.program_id(1)                      # tile index within slice   -- "arbitrary"
    tile_n = emb_ref.shape[0]
    b_pad = part_ref.shape[0]

    @pl.when(j == 0)
    def _init():
        part_ref[...] = jnp.zeros_like(part_ref)

    # Global (unclamped) tile index. The BlockSpec index_map clamps the DMA source for
    # grid-padding tiles; the masks below zero any contribution past the real node count.
    t = s * pl.num_programs(1) + j
    node0 = t * tile_n

    lane = jax.lax.broadcasted_iota(jnp.int32, (1, tile_n), 1)
    valid_row = (node0 + lane) < n_nodes                            # (1, TILE_N)
    ids = jnp.where(valid_row, ids_ref[...], -1)                    # OOB nodes match nothing

    gids = jax.lax.broadcasted_iota(jnp.int32, (b_pad, tile_n), 0)
    onehot = (gids == ids).astype(emb_ref.dtype)                    # (B_pad, TILE_N) 0/1, emb dtype

    # Zero garbage rows of a partial tail tile so stale NaN/Inf in the DMA buffer can never
    # leak through 0 * x in the MXU accumulate. Small VPU pass, hidden under the HBM stream.
    col = jax.lax.broadcasted_iota(jnp.int32, (tile_n, 1), 0)
    emb = jnp.where((node0 + col) < n_nodes, emb_ref[...], 0)

    # Segment sum via MXU: 0/1 x value with f32 accumulation is exact.
    part_ref[...] += jnp.dot(onehot, emb, preferred_element_type=jnp.float32)


def _head_kernel(part_ref, invc_ref, w1_ref, b1_ref, w2_ref, b2_ref, out_ref):
    """Tiny epilogue: combine per-slice partials, take the mean, run the reg MLP head.

    part_ref : (S, B_pad, D) f32   per-slice partial segment sums
    invc_ref : (B_pad, 1)    f32   exact 1 / max(node count, 1) per graph
    w1_ref   : (D, H) f32 ; b1_ref : (1, H) f32
    w2_ref   : (1, H) f32 ; b2_ref : (1, 1) f32
    out_ref  : (1, B_pad)    f32   lane-dense result row
    """
    total = part_ref[0]
    for k in range(1, part_ref.shape[0]):     # static unroll over the few slices
        total = total + part_ref[k]
    pooled = total * invc_ref[...]            # (B_pad, D) mean-pooled

    h = jnp.dot(pooled, w1_ref[...], preferred_element_type=jnp.float32) + b1_ref[...]
    h = jnp.maximum(h, 0.0)                   # ReLU; Dropout in eval mode = identity
    # (1, H) . (B_pad, H)^T -> (1, B_pad): lane-dense output, no width-1 store column.
    out = jax.lax.dot_general(w2_ref[...], h, (((1,), (1,)), ((), ())),
                              preferred_element_type=jnp.float32) + b2_ref[...]
    out_ref[...] = out.astype(out_ref.dtype)


def finetuner_forward(node_embeddings, batch_ids, params, num_graphs, *,
                      tile_n=2048, num_slices=2):
    """Runs the fused Pallas kernels; returns shape [num_graphs]."""
    N, D = node_embeddings.shape
    H = params["w1"].shape[1]
    B = int(num_graphs)
    b_pad = max(8, -(-B // 8) * 8)                                  # sublane-friendly row count

    batch_ids = batch_ids.astype(jnp.int32)
    ids2d = batch_ids.reshape(1, N)                                  # metadata-only reshape

    # Exact per-graph node counts / reciprocals from the tiny id vector (reads N*4 bytes).
    counts = jnp.bincount(batch_ids, length=b_pad).astype(jnp.float32)
    inv_cnt = (1.0 / jnp.maximum(counts, 1.0)).reshape(b_pad, 1)

    w1 = params["w1"].astype(jnp.float32)                            # (D, H)
    b1 = params["b1"].reshape(1, H).astype(jnp.float32)              # (1, H)
    w2 = params["w2"].reshape(1, H).astype(jnp.float32)              # (1, H) row vector
    b2 = params["b2"].reshape(1, 1).astype(jnp.float32)              # (1, 1)

    n_tiles = -(-N // tile_n)
    num_slices = max(1, min(int(num_slices), n_tiles))
    tiles_per_slice = -(-n_tiles // num_slices)

    def _tile_index(s, j):
        # Clamp the DMA source for grid-padding tiles; their contribution is masked in-kernel.
        return jnp.minimum(s * tiles_per_slice + j, n_tiles - 1)

    cost = pl.CostEstimate(
        flops=2 * b_pad * num_slices * tiles_per_slice * tile_n * D,
        transcendentals=0,
        bytes_accessed=(N * D * node_embeddings.dtype.itemsize      # embedding stream
                        + N * 4                                      # batch ids
                        + num_slices * b_pad * D * 4),               # partial sums
    )

    # Phase 1: streaming segment-sum. Grid = (slice, node-tile); the slice axis is "parallel"
    # so v7x runs one slice per TensorCore; on 1-TC chips it simply serializes.
    partials = pl.pallas_call(
        functools.partial(_pool_kernel, n_nodes=N),
        out_shape=jax.ShapeDtypeStruct((num_slices, b_pad, D), jnp.float32),
        grid=(num_slices, tiles_per_slice),
        in_specs=[
            pl.BlockSpec((1, tile_n), lambda s, j: (0, _tile_index(s, j))),   # batch ids (streamed)
            pl.BlockSpec((tile_n, D), lambda s, j: (_tile_index(s, j), 0)),   # node embeddings (streamed)
        ],
        out_specs=pl.BlockSpec((None, b_pad, D), lambda s, j: (s, 0, 0)),     # per-slice partial sums
        compiler_params=pltpu.CompilerParams(
            dimension_semantics=("parallel", "arbitrary"),
            vmem_limit_bytes=32 * 1024 * 1024,
        ),
        cost_estimate=cost,
    )(ids2d, node_embeddings)

    # Phase 2: tiny epilogue — combine partials + mean + MLP head, lane-dense (1, B_pad) output.
    out = pl.pallas_call(
        _head_kernel,
        out_shape=jax.ShapeDtypeStruct((1, b_pad), jnp.float32),
        grid=(1,),
        in_specs=[
            pl.BlockSpec((num_slices, b_pad, D), lambda i: (0, 0, 0)),
            pl.BlockSpec((b_pad, 1), lambda i: (0, 0)),
            pl.BlockSpec((D, H), lambda i: (0, 0)),
            pl.BlockSpec((1, H), lambda i: (0, 0)),
            pl.BlockSpec((1, H), lambda i: (0, 0)),
            pl.BlockSpec((1, 1), lambda i: (0, 0)),
        ],
        out_specs=pl.BlockSpec((1, b_pad), lambda i: (0, 0)),
    )(partials, inv_cnt, w1, b1, w2, b2)

    # NOTE: torch .squeeze() would give a 0-d scalar when num_graphs == 1; we return [B].
    return out[0, :B]


def _reference(node_embeddings, batch_ids, params, num_graphs):
    """Pure-JAX reference (f32 math on the same embedding values the kernel streams)."""
    emb = node_embeddings.astype(jnp.float32)
    onehot = (jnp.arange(num_graphs)[:, None] == batch_ids[None, :]).astype(jnp.float32)
    sums = jnp.dot(onehot, emb, precision=jax.lax.Precision.HIGHEST)
    counts = jnp.maximum(onehot.sum(-1, keepdims=True), 1.0)
    pooled = sums / counts
    h = jnp.maximum(
        jnp.dot(pooled, params["w1"].astype(jnp.float32), precision=jax.lax.Precision.HIGHEST)
        + params["b1"].reshape(1, -1), 0.0)
    out = (jnp.dot(h, params["w2"].reshape(-1, 1), precision=jax.lax.Precision.HIGHEST)
           + params["b2"].reshape(1, 1))
    return out.squeeze(-1)


if __name__ == "__main__":
    # Small shapes consistent with the module (embed_dim/hidden_dim scaled down).
    N = 1200        # total nodes: ragged vs TILE_N -> exercises tail masking + clamped grid padding
    D = 128         # embed_dim (module default 400, scaled down)
    H = 256         # hidden_dim (module default 1024, scaled down)
    B = 4           # number of graphs in the batch
    TILE_N = 256    # small demo tile so each slice runs several pipelined grid steps
                    # (production default is tile_n=2048 to amortize per-step overhead)

    key = jax.random.PRNGKey(0)
    k_emb, k_w1, k_b1, k_w2, k_b2 = jax.random.split(key, 5)

    # The upstream GNN (atom_embedder / model2D) is external; here it "emits" bf16 node
    # embeddings directly, so the kernel streams them with no wrapper-side cast/pad passes.
    node_embeddings = jax.random.normal(k_emb, (N, D), dtype=jnp.bfloat16)
    # Deterministic batch assignment: nodes split evenly across B graphs.
    batch_ids = jnp.repeat(jnp.arange(B, dtype=jnp.int32), N // B)

    params = {
        "w1": jax.random.normal(k_w1, (D, H), dtype=jnp.float32) * 0.05,
        "b1": jax.random.normal(k_b1, (1, H), dtype=jnp.float32) * 0.05,
        "w2": jax.random.normal(k_w2, (H, 1), dtype=jnp.float32) * 0.05,
        "b2": jax.random.normal(k_b2, (1, 1), dtype=jnp.float32) * 0.05,
    }

    out = finetuner_forward(node_embeddings, batch_ids, params, B,
                            tile_n=TILE_N, num_slices=2)
    out = jax.block_until_ready(out)

    ref = _reference(node_embeddings, batch_ids, params, B)
    assert out.shape == (B,), out.shape
    assert jnp.allclose(out, ref, atol=2e-3, rtol=2e-2), (out, ref)

    print("KERNEL_OK")
</pallas_src>

<mosaic_0001>
module attributes {stable_mosaic.version = 11 : i64} {
  func.func @_pool_kernel(%arg0: i32, %arg1: i32, %arg2: memref<1x256xi32, #tpu.memory_space<vmem>>, %arg3: memref<256x128xbf16, #tpu.memory_space<vmem>>, %arg4: memref<1x8x128xf32, #tpu.memory_space<vmem>>) attributes {dimension_semantics = [#tpu.dimension_semantics<parallel>, #tpu.dimension_semantics<arbitrary>], iteration_bounds = array<i64: 2, 3>, scalar_prefetch = 0 : i64, scratch_operands = 0 : i64, tpu.core_type = #tpu.core_type<tc>, window_params = [{transform_indices = @transform_0, window_bounds = array<i64: 1, 256>}, {transform_indices = @transform_1, window_bounds = array<i64: 256, 128>}, {transform_indices = @transform_2, window_bounds = array<i64: 1, 8, 128>}]} {
    %c0_i32 = arith.constant 0 : i32
    %0 = arith.cmpi eq, %arg1, %c0_i32 : i32
    %1 = arith.extui %0 : i1 to i32
    %c0_i32_0 = arith.constant 0 : i32
    %2 = arith.cmpi ne, %1, %c0_i32_0 : i32
    scf.if %2 {
      %cst_12 = arith.constant 0.000000e+00 : f32
      %38 = vector.broadcast %cst_12 : f32 to vector<8x128xf32>
      %c0_13 = arith.constant 0 : index
      %c0_14 = arith.constant 0 : index
      %c0_15 = arith.constant 0 : index
      %39 = vector.load %arg4[%c0_13, %c0_14, %c0_15] : memref<1x8x128xf32, #tpu.memory_space<vmem>>, vector<1x8x128xf32>
      %40 = vector.shape_cast %39 : vector<1x8x128xf32> to vector<8x128xf32>
      %41 = vector.shape_cast %38 : vector<8x128xf32> to vector<1x8x128xf32>
      tpu.vector_store %arg4[%c0_13, %c0_14, %c0_15], %41 {strides = array<i32>} : memref<1x8x128xf32, #tpu.memory_space<vmem>>, vector<1x8x128xf32>,
    } else {
    }
    %c3_i32 = arith.constant 3 : i32
    %3 = arith.muli %arg0, %c3_i32 : i32
    %4 = arith.addi %3, %arg1 : i32
    %c256_i32 = arith.constant 256 : i32
    %5 = arith.muli %4, %c256_i32 : i32
    %6 = tpu.iota {dimensions = array<i32: 1>} : vector<1x256xi32>
    %7 = vector.broadcast %5 : i32 to vector<1x256xi32>
    %8 = arith.addi %7, %6 : vector<1x256xi32>
    %c1200_i32 = arith.constant 1200 : i32
    %9 = vector.broadcast %c1200_i32 : i32 to vector<1x256xi32>
    %10 = arith.cmpi slt, %8, %9 : vector<1x256xi32>
    %c0 = arith.constant 0 : index
    %c0_1 = arith.constant 0 : index
    %11 = vector.load %arg2[%c0, %c0_1] : memref<1x256xi32, #tpu.memory_space<vmem>>, vector<1x256xi32>
    %c-1_i32 = arith.constant -1 : i32
    %12 = vector.broadcast %c-1_i32 : i32 to vector<1x256xi32>
    %13 = arith.select %10, %11, %12 : vector<1x256xi1>, vector<1x256xi32>
    %14 = tpu.iota {dimensions = array<i32: 0>} : vector<8x256xi32>
    %15 = vector.broadcast %13 : vector<1x256xi32> to vector<8x256xi32>
    %16 = arith.cmpi eq, %14, %15 : vector<8x256xi32>
    %17 = arith.extui %16 : vector<8x256xi1> to vector<8x256xi32>
    %18 = arith.sitofp %17 : vector<8x256xi32> to vector<8x256xf32>
    %19 = arith.truncf %18 : vector<8x256xf32> to vector<8x256xbf16>
    %20 = tpu.iota {dimensions = array<i32: 0>} : vector<256x1xi32>
    %21 = vector.broadcast %5 : i32 to vector<256x1xi32>
    %22 = arith.addi %21, %20 : vector<256x1xi32>
    %c1200_i32_2 = arith.constant 1200 : i32
    %23 = vector.broadcast %c1200_i32_2 : i32 to vector<256x1xi32>
    %24 = arith.cmpi slt, %22, %23 : vector<256x1xi32>
    %c0_3 = arith.constant 0 : index
    %c0_4 = arith.constant 0 : index
    %25 = vector.load %arg3[%c0_3, %c0_4] : memref<256x128xbf16, #tpu.memory_space<vmem>>, vector<256x128xbf16>
    %c0_i32_5 = arith.constant 0 : i32
    %26 = arith.sitofp %c0_i32_5 : i32 to bf16
    %27 = vector.shape_cast %24 : vector<256x1xi1> to vector<256x1xi1>
    %28 = vector.broadcast %27 : vector<256x1xi1> to vector<256x128xi1>
    %29 = vector.broadcast %26 : bf16 to vector<256x128xbf16>
    %30 = arith.select %28, %25, %29 : vector<256x128xi1>, vector<256x128xbf16>
    %c0_6 = arith.constant 0 : index
    %c0_7 = arith.constant 0 : index
    %c0_8 = arith.constant 0 : index
    %31 = vector.load %arg4[%c0_6, %c0_7, %c0_8] : memref<1x8x128xf32, #tpu.memory_space<vmem>>, vector<1x8x128xf32>
    %32 = vector.shape_cast %31 : vector<1x8x128xf32> to vector<8x128xf32>
    %cst = arith.constant dense<0.000000e+00> : vector<8x128xf32>
    %33 = tpu.matmul %19, %30, %cst {dimension_numbers = #tpu.dot_dimension_numbers<[1], [0], [0], [1], [0, 0, 1, 1], [], []>} : vector<8x256xbf16>, vector<256x128xbf16>, vector<8x128xf32> -> vector<8x128xf32>
    %34 = arith.addf %32, %33 : vector<8x128xf32>
    %c0_9 = arith.constant 0 : index
    %c0_10 = arith.constant 0 : index
    %c0_11 = arith.constant 0 : index
    %35 = vector.load %arg4[%c0_9, %c0_10, %c0_11] : memref<1x8x128xf32, #tpu.memory_space<vmem>>, vector<1x8x128xf32>
    %36 = vector.shape_cast %35 : vector<1x8x128xf32> to vector<8x128xf32>
    %37 = vector.shape_cast %34 : vector<8x128xf32> to vector<1x8x128xf32>
    tpu.vector_store %arg4[%c0_9, %c0_10, %c0_11], %37 {strides = array<i32>} : memref<1x8x128xf32, #tpu.memory_space<vmem>>, vector<1x8x128xf32>,
    return
  }
  func.func @transform_0(%arg0: i32, %arg1: i32) -> (i32, i32) {
    %c3_i32 = arith.constant 3 : i32
    %0 = arith.muli %arg0, %c3_i32 : i32
    %1 = arith.addi %0, %arg1 : i32
    %c4_i32 = arith.constant 4 : i32
    %2 = arith.minsi %1, %c4_i32 : i32
    %c0_i32 = arith.constant 0 : i32
    %c0_i32_0 = arith.constant 0 : i32
    return %c0_i32, %2 : i32, i32
  }
  func.func @transform_1(%arg0: i32, %arg1: i32) -> (i32, i32) {
    %c3_i32 = arith.constant 3 : i32
    %0 = arith.muli %arg0, %c3_i32 : i32
    %1 = arith.addi %0, %arg1 : i32
    %c4_i32 = arith.constant 4 : i32
    %2 = arith.minsi %1, %c4_i32 : i32
    %c0_i32 = arith.constant 0 : i32
    %c0_i32_0 = arith.constant 0 : i32
    return %2, %c0_i32 : i32, i32
  }
  func.func @transform_2(%arg0: i32, %arg1: i32) -> (i32, i32, i32) {
    %c0_i32 = arith.constant 0 : i32
    %c0_i32_0 = arith.constant 0 : i32
    %c0_i32_1 = arith.constant 0 : i32
    return %arg0, %c0_i32, %c0_i32_0 : i32, i32, i32
  }
}

</mosaic_0001>

<bundles_post_ra>
// kernel: tpu_custom_call.1
= control target key start
LH: loop header
LB: loop body
LE: loop exit
PB: predicated region body
PF: predicated region fallthrough
CT: control target
= control target key end

     0   :  { %7 = vsyncpa [#allocation3], 0  ;;  %s1693_s0 = inlined_call_operand.hbm [shape: s32[1,1200], index: 0, kind: input, shape index: {}]   ;;  %s1694_s1 = inlined_call_operand.hbm [shape: bf16[1200,128], index: 1, kind: input, shape index: {}]   ;;  %s1695_s2 = inlined_call_operand.hbm [shape: f32[2,8,128], index: 2, kind: output, shape index: {}]  }
   0x1   :  { %9 = vsyncpa [#allocation3 + $0x1], 0 }
   0x2   :  { %10 = vsyncpa [#allocation6], 0 }
   0x3   :  { %12 = vsyncpa [#allocation6 + $0x1], 0 }
   0x4   :  { %13 = vsyncpa [#allocation4], 0 }
   0x5   :  { %15 = vsyncpa [#allocation4 + $0x1], 0  ;;  %s1192_s9 = smov 0   ;;  %s1194_s10 = smov 0  }
   0x6   :  { %s1196_s11 = smov 0   ;;  %s1198_s12 = smov 0  }
   0x7   :  { %s1200_s13 = smov 0   ;;  %s1202_s14 = smov 0  }
   0x8   :  { %s1204_s15 = smov 0   ;;  %s1206_s16 = smov 0  }
   0x9   :  { %s1208_s17 = smov 0   ;;  %s1210_s18 = smov 0  }
   0xa   :  { %s1212_s19 = smov 0  }
   0xb LB: > { %1703 = sst [smem:[#allocation11_spill]] %s1160_s17  ;;  %s814_s20 = sadd.s32 4294967295, %s1168_s19   ;;  %s1168_s19 = sphi %s1212_s19, %s21_s19   ;;  %s1164_s18 = sphi %s1210_s18, %s1748_s18   ;;  %s1160_s17 = sphi %s1208_s17, %s1747_s17   ;;  %s1156_s16 = sphi %s1206_s16, %s1746_s16   ;;  %s1152_s15 = sphi %s1204_s15, %s1745_s15   ;;  %s1148_s14 = sphi %s1202_s14, %s1754_s14   ;;  %s1144_s13 = sphi %s1200_s13, %s1753_s13   ;;  %s1140_s12 = sphi %s1198_s12, %s1752_s12   ;;  %s1136_s11 = sphi %s1196_s11, %s1751_s11   ;;  %s1132_s10 = sphi %s1194_s10, %s1750_s10   ;;  %s1128_s9 = sphi %s1192_s9, %s1749_s9  }
   0xc   : > { %1704 = sst [smem:[#allocation12_spill]] %s1164_s18  ;;  %s815_s21 = sadd.s32 4294967294, %s1168_s19  }
   0xd   : > { %s30_s22 = sadd.s32 1, %s1160_s17  ;;  %s33_s23 = sadd.s32 1, %s1164_s18 }
   0xe   : > { %p31_p0 = scmp.ge.s32.totalorder %s30_s22, 3  ;;  %s37_s24 = smul.u32 3, %s1164_s18 }
   0xf   : > { %s48_s25 = sadd.s32 1, %s1148_s14  ;;  %p55_p1 = scmp.ne.s32.totalorder %s1148_s14, %s1144_s13 }
  0x10   : > { %s1756_s22 = smov (%p31_p0, %s30_s22), 0  ;;  %s1758_s23 = smov (!%p31_p0, %s33_s23), %s1164_s18 }
  0x11   : > { %1705 = sst [smem:[#allocation13_spill]] %s1756_s22  ;;  %s38_s26 = sadd.s32 %s1160_s17, %s37_s24 }
  0x12   : > { %p56_p2 = scmp.eq.s32.totalorder %s1168_s19, 0  ;;  %p35_p3 = scmp.ge.s32.totalorder %s1758_s23, 2 }
  0x13   : > { %p39_p4 = scmp.lt.s32.totalorder %s38_s26, 4  ;;  %p61_p6 = scmp.ne.s32.totalorder %s1144_s13, %s1140_s12 }
  0x14   : > { %p1260_p5 = por %p56_p2, %p55_p1  ;;  %s1760_s23 = smov (%p35_p3, %s1758_s23), 0 }
  0x15   : > { %1707 = sst [smem:[#allocation14_spill]] %s1760_s23  ;;  %s1762_s26 = smov (!%p39_p4, %s38_s26), 4 }
  0x16   : > { %s41_s28 = smul.u32 3, %s1760_s23  ;;  %p62_p7 = scmp.eq.s32.totalorder %s814_s20, 0 }
  0x17   : > { %s105_s29 = ssub.s32 %s1164_s18, %s1760_s23  ;;  %s108_s30 = sadd.s32 1, %s1136_s11 }
  0x18   : > { %s42_s3 = sadd.s32 %s41_s28, %s1756_s22  ;;  %p1275_p8 = por %p62_p7, %p61_p6 }
  0x19   : > { %p43_p9 = scmp.lt.s32.totalorder %s42_s3, 4  ;;  %p106_p10 = scmp.eq.s32.totalorder %s105_s29, 0 }
  0x1a   : > { %s1708_s4 = scalar_select %p1275_p8, 1, 0 }
  0x1b   : > { %p118_p11 = scmp.ne.s32.totalorder %s1136_s11, %s1132_s10  ;;  %p119_p12 = scmp.eq.s32.totalorder %s814_s20, 5 }
  0x1c   : > { %s1764_s3 = smov (!%p43_p9, %s42_s3), 4  ;;  %p124_p1 = scmp.ne.s32.totalorder %s1132_s10, %s1128_s9 }
  0x1d   : > { %s1282_s5 = scalar_select %p106_p10, %s1136_s11, %s108_s30  }
  0x1e   : > { %s45_s6 = ssub.s32 %s1762_s26, %s1764_s3  ;;  %p1285_p13 = por %p119_p12, %p118_p11 }
  0x1f   : > { %p46_p0 = scmp.eq.s32.totalorder %s45_s6, 0  ;;  %p125_p2 = scmp.eq.s32.totalorder %s815_s21, 5 }
  0x20   : > { %s1709_s7 = scalar_select %p1285_p13, 1, 0 }
  0x21   : > { %s1296_s8 = scalar_select %p46_p0, %s1148_s14, %s48_s25  }
  0x22   : > { %p1298_p3 = por %p125_p2, %p124_p1  ;;  %p817_p4 = scmp.ge.s32.totalorder %s1168_s19, 6 }
  0x23   : > { %s1304_s20 = sand.u32 (!%p817_p4), 1, %s1148_s14   ;;  %s1700_s24 = sshll.u32 (!%p817_p4), %s1762_s26, 5 }
  0x24   : > { %s1710_s12 = scalar_select %p1298_p3, 1, 0 }
  0x25   : > { %141 = sbr.rel (%p817_p4) target bundleno = 97 (0x61), region = 16  ;;  %s818_s21 = sshll.u32 (!%p817_p4), %s1304_s20, 1 }
  0x26   : > { %s1313_s29 = scalar_lea.hbm (!%p817_p4), %s1693_s0, %s1700_s24  ;;  %s149_s30 = scalar_lea.vmem (!%p817_p4), [#allocation2], %s818_s21 }
  0x27   : > { %s161_s3 = sshll.u32 (!%p817_p4), %s149_s30, 4  ;;  %s146_s6 = scalar_lea.sflag (!%p817_p4), [#allocation3], %s1304_s20  ;;  %s162_s3 = int_to_ptr.vmem [resolvable:$true] %s161_s3 }
  0x28   : > { %s986_s23 = scalar_lea.hbm (!%p817_p4), %s1313_s29, 32  ;;  %s990_s17 = scalar_lea.hbm (!%p817_p4), %s1693_s0, 160 }
  0x29   : > { %p987_p6 = scmp.ne.s32.totalorder (!%p817_p4), %s1313_s29, %s986_s23  ;;  %p991_p10 = scmp.lt.u32.totalorder (!%p817_p4), %s1313_s29, %s1693_s0 }
  0x2a   : > { %p992_p11 = scmp.lt.u32.totalorder (!%p817_p4), %s990_s17, %s986_s23  ;;  %p994_p0 = scmp.lt.u32.totalorder (!%p817_p4), %s986_s23, %s1313_s29 }
  0x2b   : > { %p988_p7 = pnand (!%p817_p4), %p987_p6, %p1260_p5 }
  0x2c   : > { %p993_p12 = por %p992_p11, %p991_p10 }
  0x2d   : > { %p989_p9 = pneg %p988_p7 }
  0x2e   : > { %p995_p1 = por %p994_p0, %p993_p12 }
  0x30   : > { %p996_p2 = pnand %p995_p1, %p989_p9 }
  0x32   : > { %999 = shalt.err (!%p996_p2)
}
  0x33   : > { %s1000_s21 = scalar_lea.vmem %s162_s3, 32  ;;  %s1170_s30 = smov [#allocation2]  }
  0x34   : > { %p1001_p4 = scmp.ne.s32.totalorder %s162_s3, %s1000_s21  ;;  %s1004_s24 = sshll.u32 %s1170_s30, 4  ;;  %s1005_s24 = int_to_ptr.vmem [resolvable:$false] %s1004_s24 }
  0x35   : > { %s1006_s18 = scalar_lea.vmem %s1005_s24, 64  ;;  %p1007_p3 = scmp.lt.s32.totalorder %s162_s3, %s1005_s24 }
  0x36   : > { %p1002_p6 = pnand %p1001_p4, %p1260_p5  ;;  %p1008_p13 = scmp.lt.s32.totalorder %s1006_s18, %s1000_s21 }
  0x38   : > { %p1003_p7 = pneg %p1002_p6  ;;  %p1009_p8 = por %p1008_p13, %p1007_p3 }
  0x3a   : > { %p1010_p10 = pnand %p1009_p8, %p1003_p7 }
  0x3c   : > { %1013 = shalt.err (!%p1010_p10)
}
  0x3d   : > { %884 = dma.hbm_to_vmem [thread:$0]  (%p1260_p5), %s1313_s29, 32, %s162_s3, %s146_s6  }
  0x3e   : > { %167 = sbr.rel (!%p1260_p5) target bundleno = 97 (0x61), region = 24  ;;  %s821_s17 = sshll.u32 (%p1260_p5), %s1304_s20, 7 }
  0x3f   : > { %s1711_s22 = sshll.u32 (%p1260_p5), %s1762_s26, 5  ;;  %s169_s28 = scalar_lea.sflag (%p1260_p5), [#allocation6], %s1304_s20 }
  0x40   : > { %s178_s23 = ssub.s32 (%p1260_p5), 150, %s1711_s22  ;;  %s172_s21 = scalar_lea.vmem (%p1260_p5), [#allocation5], %s821_s17 }
  0x41   : > { %p179_p9 = scmp.lt.s32.totalorder (%p1260_p5), %s178_s23, 32 }
  0x45   : > { %s1766_s23 = smov (!%p179_p9, %s178_s23), 32 }
  0x46   : > { %s1338_s24 = sshll.u32 %s1766_s23, 6 }
  0x47   : > { %s183_s25 = ssub.s32 2048, %s1338_s24 }
  0x48   : > { %184 = vsyncadd %s169_s28, %s183_s25  ;;  %p824_p5 = scmp.ne.s32.totalorder %s1338_s24, 0  ;;  %s861_s27 = sshll.u32 %s1762_s26, 11 }
  0x49   : > { %s1349_s6 = scalar_lea.hbm %s1694_s1, %s861_s27  ;;  %s189_s30 = sshll.u32 %s172_s21, 4  ;;  %s1351_s30 = int_to_ptr.vmem [resolvable:$true] %s189_s30 }
  0x4a   : > { %s1014_s18 = scalar_lea.hbm %s1349_s6, %s1338_s24  ;;  %s1018_s26 = scalar_lea.hbm %s1694_s1, 9600 }
  0x4b   : > { %p1015_p8 = scmp.ne.s32.totalorder %s1349_s6, %s1014_s18  ;;  %p1019_p11 = scmp.lt.u32.totalorder %s1349_s6, %s1694_s1 }
  0x4c   : > { %p1020_p12 = scmp.lt.u32.totalorder %s1018_s26, %s1014_s18  ;;  %p1022_p1 = scmp.lt.u32.totalorder %s1014_s18, %s1349_s6 }
  0x4d   : > { %p1016_p13 = pnand %p1015_p8, %p824_p5 }
  0x4e   : > { %p1021_p0 = por %p1020_p12, %p1019_p11 }
  0x4f   : > { %p1017_p3 = pneg %p1016_p13 }
  0x50   : > { %p1023_p2 = por %p1022_p1, %p1021_p0 }
  0x52   : > { %p1024_p4 = pnand %p1023_p2, %p1017_p3 }
  0x54   : > { %1027 = shalt.err (!%p1024_p4)
}
  0x55   : > { %s1028_s21 = scalar_lea.vmem %s1351_s30, %s1338_s24  ;;  %s1171_s27 = smov [#allocation5]  }
  0x56   : > { %p1029_p6 = scmp.ne.s32.totalorder %s1351_s30, %s1028_s21  ;;  %s1032_s29 = sshll.u32 %s1171_s27, 4  ;;  %s1033_s29 = int_to_ptr.vmem [resolvable:$false] %s1032_s29 }
  0x57   : > { %s1034_s3 = scalar_lea.vmem %s1033_s29, 4096  ;;  %p1035_p9 = scmp.lt.s32.totalorder %s1351_s30, %s1033_s29 }
  0x58   : > { %p1030_p7 = pnand %p1029_p6, %p824_p5  ;;  %p1036_p8 = scmp.lt.s32.totalorder %s1034_s3, %s1028_s21 }
  0x5a   : > { %p1031_p10 = pneg %p1030_p7  ;;  %p1037_p13 = por %p1036_p8, %p1035_p9 }
  0x5c   : > { %p1038_p11 = pnand %p1037_p13, %p1031_p10 }
  0x5e   : > { %1041 = shalt.err (!%p1038_p11)
}
  0x5f   : > { %s1172_s18 = smov 64   ;;  %s1173_s17 = smov 4  }
  0x60   : > { %195 = dma.hbm_to_vmem [thread:$0]  (%p824_p5), %s1349_s6, %s1338_s24, %s1351_s30, %s169_s28, %s1172_s18, %s1172_s18, %s1173_s17  }
  0x61 PF: > { %p828_p3 = scmp.ge.s32.totalorder %s1168_s19, 1  ;;  %p197_p12 = scmp.lt.s32.totalorder %s1168_s19, 7 }
  0x63   : > { %p198_p0 = pnand %p828_p3, %p197_p12 }
  0x64   : > { %s203_s22 = sand.u32 (!%p198_p0), 1, %s1144_s13   ;;  %p1712_p1 = scmp.ne.s32.totalorder (!%p198_p0), %s1708_s4, 0 }
  0x65   : > { %201 = sbr.rel (%p198_p0) target bundleno = 401 (0x191), region = 28  ;;  %s829_s26 = sshll.u32 (!%p198_p0), %s203_s22, 1 }
  0x66   : > { %s204_s23 = scalar_lea.sflag (!%p198_p0), [#allocation3], %s203_s22  ;;  %s1382_s25 = scalar_lea.vmem (!%p198_p0), [#allocation2], %s829_s26 }
  0x6c   : > { %1115 = dma.done.wait (%p1712_p1), %s204_s23, 32  }
  0x6d   : > { %1117 = vsyncadd (%p1712_p1), %s204_s23, 4294967264  ;;  %s830_s20 = sshll.u32 %s203_s22, 7  ;;  %s213_s24 = scalar_lea.sflag [#allocation6], %s203_s22 }
  0x6e   : > { %s1388_s28 = scalar_lea.vmem [#allocation5], %s830_s20 }
  0x6f   : > { %1119 = dma.done.wait (%p1712_p1), %s213_s24, 2048  }
  0x70   : > { %1121 = vsyncadd (%p1712_p1), %s213_s24, 4294965248  ;;  %s239_s6 = sand.u32 1, %s1132_s10   ;;  %p832_p5 = scmp.ne.s32.totalorder %s1152_s15, 0 }
  0x71   : > { %s831_s30 = sshll.u32 %s239_s6, 3  ;;  %v1174_v0 = vmov (!%p832_p5), 0.0  }
  0x72   : > { %s1397_s21 = scalar_lea.vmem [#allocation7], %s831_s30  ;;  %260 = sbr.rel (%p832_p5) target bundleno = 121 (0x79), region = 40 }
  0x73   : > { %261 = vst [vmem:[%s1397_s21] sm:$0xff] (!%p832_p5), %v1174_v0 }
  0x79 PF: > { %s262_s27 = smul.u32 3, %s1156_s16  ;;  %v265_v1 = vlaneseq  ;;  %v397_v15 = vld [vmem:[%s1388_s28] sm:$0xf]  ;;  %v414_v21 = vld [vmem:[%s1388_s28 + $0x44] sm:$0xf]  ;;  %s710_s3 = sshll.u32 %s1397_s21, 4  ;;  %s1630_s3 = int_to_ptr.vmem [resolvable:$true] %s710_s3 }
  0x7a   : > { %v413_v17 = vld [vmem:[%s1388_s28 + $0x40] sm:$0xf]  ;;  %v398_v25 = vld [vmem:[%s1388_s28 + $0x4] sm:$0xf]  ;;  %v415_v28 = vld [vmem:[%s1388_s28 + $0x48] sm:$0xf] }
  0x7b   : > { %s263_s4 = sadd.s32 %s1152_s15, %s262_s27  ;;  %v1403_v2 = vshrl.u32 %v265_v1, 7  ;;  %v1405_v3 = vand.u32 127, %v265_v1  ;;  %v416_v32 = vld [vmem:[%s1388_s28 + $0x4c] sm:$0xf]  ;;  %v399_v39 = vld [vmem:[%s1388_s28 + $0x8] sm:$0xf] }
  0x7c   : > { %s833_s29 = sshll.u32 %s263_s4, 8  ;;  %v400_v44 = vld [vmem:[%s1388_s28 + $0xc] sm:$0xf]  ;;  %v417_v49 = vld [vmem:[%s1388_s28 + $0x50] sm:$0xf]  ;;  %s857_s15 = sshll.u32 %s1156_s16, 7 }
  0x7d   : > { %v1407_v4 = vstv %s833_s29  ;;  %v317_v5 = vadd.s32 128, %v1403_v2  ;;  %v318_v6 = vadd.s32 136, %v1403_v2  ;;  %v302_v7 = vadd.s32 8, %v1403_v2  ;;  %v418_v53 = vld [vmem:[%s1388_s28 + $0x54] sm:$0xf]  ;;  %s1628_s22 = scalar_lea.hbm %s1695_s2, %s857_s15  ;;  %s697_s26 = scalar_lea.sflag [#allocation4], %s239_s6 }
  0x7e   : > { %v333_v8 = vadd.s32 %v1403_v2, %v1407_v4  ;;  %v319_v9 = vadd.s32 144, %v1403_v2  ;;  %v320_v10 = vadd.s32 152, %v1403_v2  ;;  %v303_v11 = vadd.s32 16, %v1403_v2  ;;  %v401_v56 = vld [vmem:[%s1388_s28 + $0x10] sm:$0xf]  ;;  %s1042_s23 = scalar_lea.vmem %s1630_s3, 128 }
  0x7f   : > { %v349_v12 = vadd.s32 %v317_v5, %v1407_v4  ;;  %v350_v13 = vadd.s32 %v318_v6, %v1407_v4  ;;  %v334_v14 = vadd.s32 %v302_v7, %v1407_v4  ;;  %v304_v16 = vadd.s32 24, %v1403_v2  ;;  %v402_v62 = vld [vmem:[%s1388_s28 + $0x14] sm:$0xf]  ;;  %v419_v6 = vld [vmem:[%s1388_s28 + $0x58] sm:$0xf]  ;;  %p1043_p2 = scmp.ne.s32.totalorder %s1630_s3, %s1042_s23  ;;  %p1743_p4 = scmp.ne.s32.totalorder %s1709_s7, 0 }
  0x80   : > { %vm365_vm0 = vcmp.lt.s32.totalorder %v333_v8, 1200  ;;  %v351_v18 = vadd.s32 %v319_v9, %v1407_v4  ;;  %v352_v19 = vadd.s32 %v320_v10, %v1407_v4  ;;  %v335_v20 = vadd.s32 %v303_v11, %v1407_v4  ;;  %v420_v10 = vld [vmem:[%s1388_s28 + $0x5c] sm:$0xf]  ;;  %v421_v24 = vld [vmem:[%s1388_s28 + $0x60] sm:$0xf]  ;;  %s1176_s16 = smov [#allocation7]  }
  0x81   : > { %vm381_vm1 = vcmp.lt.s32.totalorder %v349_v12, 1200  ;;  %vm382_vm2 = vcmp.lt.s32.totalorder %v350_v13, 1200  ;;  %vm366_vm3 = vcmp.lt.s32.totalorder %v334_v14, 1200  ;;  %vm1427_vm4 = vmpackc.low %vm365_vm0, %vm365_vm0  ;;  %v336_v23 = vadd.s32 %v304_v16, %v1407_v4  ;;  %v406_v38 = vld [vmem:[%s1388_s28 + $0x24] sm:$0xf]  ;;  %p1044_p6 = pnand %p1043_p2, %p1743_p4 }
  0x82   : > { %vm1432_vm5 = vmpackc.low %vm381_vm1, %vm381_vm1  ;;  %v525_v26 = vsel %vm1427_vm4, %v397_v15, 0  ;;  %vm383_vm6 = vcmp.lt.s32.totalorder %v351_v18, 1200  ;;  %vm384_vm7 = vcmp.lt.s32.totalorder %v352_v19, 1200  ;;  %vm367_vm8 = vcmp.lt.s32.totalorder %v335_v20, 1200  ;;  %v403_v15 = vld [vmem:[%s1388_s28 + $0x18] sm:$0xf] }
  0x83   : > { %vm510_vm9 = vmpackc.low %vm382_vm2, %vm382_vm2  ;;  %v541_v27 = vsel %vm1432_vm5, %v413_v17, 0  ;;  %vm368_vm10 = vcmp.lt.s32.totalorder %v336_v23, 1200  ;;  %v321_v29 = vadd.s32 160, %v1403_v2  ;;  %v322_v30 = vadd.s32 168, %v1403_v2  ;;  %v404_v20 = vld [vmem:[%s1388_s28 + $0x1c] sm:$0xf]  ;;  %p1045_p7 = pneg %p1044_p6 }
  0x84   : > { %v542_v31 = vsel %vm510_vm9, %v414_v21, 0  ;;  %vm494_vm11 = vmpackc.low %vm366_vm3, %vm366_vm3  ;;  %v305_v33 = vadd.s32 32, %v1403_v2  ;;  %v306_v34 = vadd.s32 40, %v1403_v2  ;;  %v323_v35 = vadd.s32 176, %v1403_v2  ;;  %v424_v48 = vld [vmem:[%s1388_s28 + $0x6c] sm:$0xf] }
  0x85   : > { %v844_v36 = vcombine.low %v541_v27, %v542_v31  ;;  %v526_v37 = vsel %vm494_vm11, %v398_v25, 0  ;;  %vm1452_vm12 = vmpackc.low %vm383_vm6, %vm383_vm6  ;;  %v353_v40 = vadd.s32 %v321_v29, %v1407_v4  ;;  %v354_v41 = vadd.s32 %v322_v30, %v1407_v4  ;;  %v422_v29 = vld [vmem:[%s1388_s28 + $0x64] sm:$0xf]  ;;  %v425_v5 = vld [vmem:[%s1388_s28 + $0x70] sm:$0xf] }
  0x86   : > { %v836_v42 = vcombine.low %v525_v26, %v526_v37  ;;  %vm512_vm13 = vmpackc.low %vm384_vm7, %vm384_vm7  ;;  %v543_v43 = vsel %vm1452_vm12, %v415_v28, 0  ;;  %v337_v45 = vadd.s32 %v305_v33, %v1407_v4  ;;  %v338_v46 = vadd.s32 %v306_v34, %v1407_v4  ;;  %v405_v34 = vld [vmem:[%s1388_s28 + $0x20] sm:$0xf]  ;;  %v409_v14 = vld [vmem:[%s1388_s28 + $0x30] sm:$0xf] }
  0x87   : > { %862 = vmatprep.subr.bf16.mxu0 %v844_v36  ;;  %v544_v47 = vsel %vm512_vm13, %v416_v32, 0  ;;  %vm1468_vm14 = vmpackc.low %vm367_vm8, %vm367_vm8  ;;  %vm385_vm15 = vcmp.lt.s32.totalorder %v353_v40, 1200  ;;  %vm386_vm0 = vcmp.lt.s32.totalorder %v354_v41, 1200  ;;  %v324_v50 = vadd.s32 184, %v1403_v2  ;;  %v427_v23 = vld [vmem:[%s1388_s28 + $0x78] sm:$0xf] }
  0x88   : > { %863 = vmatpush3.bf16.msra.mxu0 %v836_v42  ;;  %v845_v51 = vcombine.low %v543_v43, %v544_v47  ;;  %vm496_vm1 = vmpackc.low %vm368_vm10, %vm368_vm10  ;;  %v527_v52 = vsel %vm1468_vm14, %v399_v39, 0  ;;  %vm369_vm2 = vcmp.lt.s32.totalorder %v337_v45, 1200  ;;  %vm370_vm3 = vcmp.lt.s32.totalorder %v338_v46, 1200 }
  0x89   : > { %v528_v54 = vsel %vm496_vm1, %v400_v44, 0  ;;  %vm1479_vm4 = vmpackc.low %vm385_vm15, %vm385_vm15  ;;  %v355_v57 = vadd.s32 %v323_v35, %v1407_v4  ;;  %v356_v58 = vadd.s32 %v324_v50, %v1407_v4  ;;  %v307_v59 = vadd.s32 48, %v1403_v2  ;;  %v423_v44 = vld [vmem:[%s1388_s28 + $0x68] sm:$0xf] }
  0x8a   : > { %864 = vmatprep.subr.bf16.mxu0 %v845_v51  ;;  %v837_v60 = vcombine.low %v527_v52, %v528_v54  ;;  %vm514_vm5 = vmpackc.low %vm386_vm0, %vm386_vm0  ;;  %v545_v61 = vsel %vm1479_vm4, %v417_v49, 0  ;;  %v308_v63 = vadd.s32 56, %v1403_v2  ;;  %v325_v0 = vadd.s32 192, %v1403_v2 }
  0x8b   : > { %v546_v1 = vsel %vm514_vm5, %v418_v53, 0  ;;  %vm1496_vm6 = vmpackc.low %vm369_vm2, %vm369_vm2  ;;  %vm387_vm7 = vcmp.lt.s32.totalorder %v355_v57, 1200  ;;  %vm388_vm8 = vcmp.lt.s32.totalorder %v356_v58, 1200  ;;  %v339_v7 = vadd.s32 %v307_v59, %v1407_v4  ;;  %v407_v53 = vld [vmem:[%s1388_s28 + $0x28] sm:$0xf] }
  0x8c   : > { %865 = vmatpush3.bf16.msra.mxu0 %v837_v60  ;;  %v846_v8 = vcombine.low %v545_v61, %v546_v1  ;;  %vm498_vm9 = vmpackc.low %vm370_vm3, %vm370_vm3  ;;  %v529_v9 = vsel %vm1496_vm6, %v401_v56, 0  ;;  %v340_v11 = vadd.s32 %v308_v63, %v1407_v4  ;;  %v326_v12 = vadd.s32 200, %v1403_v2  ;;  %v408_v57 = vld [vmem:[%s1388_s28 + $0x2c] sm:$0xf] }
  0x8d   : > { %v530_v13 = vsel %vm498_vm9, %v402_v62, 0  ;;  %vm1509_vm10 = vmpackc.low %vm387_vm7, %vm387_vm7  ;;  %vm371_vm11 = vcmp.lt.s32.totalorder %v339_v7, 1200  ;;  %v357_v16 = vadd.s32 %v325_v0, %v1407_v4  ;;  %v309_v17 = vadd.s32 64, %v1403_v2 }
  0x8e   : > { %866 = vmatprep.subr.bf16.mxu0 %v846_v8  ;;  %v838_v18 = vcombine.low %v529_v9, %v530_v13  ;;  %vm516_vm12 = vmpackc.low %vm388_vm8, %vm388_vm8  ;;  %v547_v19 = vsel %vm1509_vm10, %v419_v6, 0  ;;  %vm372_vm13 = vcmp.lt.s32.totalorder %v340_v11, 1200  ;;  %v358_v21 = vadd.s32 %v326_v12, %v1407_v4  ;;  %v426_v8 = vld [vmem:[%s1388_s28 + $0x74] sm:$0xf] }
  0x8f   : > { %v548_v22 = vsel %vm516_vm12, %v420_v10, 0  ;;  %vm1522_vm14 = vmpackc.low %vm371_vm11, %vm371_vm11  ;;  %vm389_vm15 = vcmp.lt.s32.totalorder %v357_v16, 1200  ;;  %v310_v25 = vadd.s32 72, %v1403_v2  ;;  %v341_v26 = vadd.s32 %v309_v17, %v1407_v4  ;;  %v410_v17 = vld [vmem:[%s1388_s28 + $0x34] sm:$0xf] }
  0x90   : > { %867 = vmatpush3.bf16.msra.mxu0 %v838_v18  ;;  %v847_v27 = vcombine.low %v547_v19, %v548_v22  ;;  %vm500_vm0 = vmpackc.low %vm372_vm13, %vm372_vm13  ;;  %v531_v28 = vsel %vm1522_vm14, %v403_v15, 0  ;;  %vm390_vm1 = vcmp.lt.s32.totalorder %v358_v21, 1200  ;;  %v327_v30 = vadd.s32 208, %v1403_v2 }
  0x91   : > { %v532_v31 = vsel %vm500_vm0, %v404_v20, 0  ;;  %vm1533_vm2 = vmpackc.low %vm389_vm15, %vm389_vm15  ;;  %v342_v33 = vadd.s32 %v310_v25, %v1407_v4  ;;  %vm373_vm3 = vcmp.lt.s32.totalorder %v341_v26, 1200  ;;  %v328_v35 = vadd.s32 216, %v1403_v2 }
  0x92   : > { %868 = vmatprep.subr.bf16.mxu0 %v847_v27  ;;  %v839_v36 = vcombine.low %v531_v28, %v532_v31  ;;  %vm518_vm4 = vmpackc.low %vm390_vm1, %vm390_vm1  ;;  %v549_v37 = vsel %vm1533_vm2, %v421_v24, 0  ;;  %v359_v39 = vadd.s32 %v327_v30, %v1407_v4  ;;  %v311_v40 = vadd.s32 80, %v1403_v2  ;;  %v428_v27 = vld [vmem:[%s1388_s28 + $0x7c] sm:$0xf] }
  0x93   : > { %v550_v41 = vsel %vm518_vm4, %v422_v29, 0  ;;  %vm374_vm5 = vcmp.lt.s32.totalorder %v342_v33, 1200  ;;  %vm1545_vm6 = vmpackc.low %vm373_vm3, %vm373_vm3  ;;  %v360_v43 = vadd.s32 %v328_v35, %v1407_v4  ;;  %v312_v45 = vadd.s32 88, %v1403_v2  ;;  %v411_v29 = vld [vmem:[%s1388_s28 + $0x38] sm:$0xf] }
  0x94   : > { %869 = vmatpush3.bf16.msra.mxu0 %v839_v36  ;;  %v848_v46 = vcombine.low %v549_v37, %v550_v41  ;;  %vm502_vm7 = vmpackc.low %vm374_vm5, %vm374_vm5  ;;  %v533_v47 = vsel %vm1545_vm6, %v405_v34, 0  ;;  %vm391_vm8 = vcmp.lt.s32.totalorder %v359_v39, 1200  ;;  %v343_v49 = vadd.s32 %v311_v40, %v1407_v4  ;;  %v273_v34 = vld [vmem:[%s1382_s25] sm:$0x3]  ;;  %s1046_s25 = sshll.u32 %s1176_s16, 4  ;;  %s1047_s25 = int_to_ptr.vmem [resolvable:$false] %s1046_s25 }
  0x95   : > { %v534_v50 = vsel %vm502_vm7, %v406_v38, 0  ;;  %vm392_vm9 = vcmp.lt.s32.totalorder %v360_v43, 1200  ;;  %vm1556_vm10 = vmpackc.low %vm391_vm8, %vm391_vm8  ;;  %v344_v52 = vadd.s32 %v312_v45, %v1407_v4  ;;  %v329_v54 = vadd.s32 224, %v1403_v2  ;;  %v412_v37 = vld [vmem:[%s1388_s28 + $0x3c] sm:$0xf]  ;;  %s1048_s20 = scalar_lea.vmem %s1047_s25, 256  ;;  %p1049_p10 = scmp.lt.s32.totalorder %s1630_s3, %s1047_s25 }
  0x96   : > { %870 = vmatprep.subr.bf16.mxu0 %v848_v46  ;;  %v840_v55 = vcombine.low %v533_v47, %v534_v50  ;;  %vm520_vm11 = vmpackc.low %vm392_vm9, %vm392_vm9  ;;  %v551_v56 = vsel %vm1556_vm10, %v423_v44, 0  ;;  %vm375_vm12 = vcmp.lt.s32.totalorder %v343_v49, 1200  ;;  %v330_v58 = vadd.s32 232, %v1403_v2  ;;  %p1050_p9 = scmp.lt.s32.totalorder %s1048_s20, %s1042_s23 }
  0x97   : > { %v552_v59 = vsel %vm520_vm11, %v424_v48, 0  ;;  %vm376_vm13 = vcmp.lt.s32.totalorder %v344_v52, 1200  ;;  %vm1567_vm14 = vmpackc.low %vm375_vm12, %vm375_vm12  ;;  %v361_v61 = vadd.s32 %v329_v54, %v1407_v4  ;;  %v313_v62 = vadd.s32 96, %v1403_v2 }
  0x98   : > { %871 = vmatpush3.bf16.msra.mxu0 %v840_v55  ;;  %v849_v63 = vcombine.low %v551_v56, %v552_v59  ;;  %vm504_vm15 = vmpackc.low %vm376_vm13, %vm376_vm13  ;;  %v535_v0 = vsel %vm1567_vm14, %v407_v53, 0  ;;  %v362_v1 = vadd.s32 %v330_v58, %v1407_v4  ;;  %v314_v6 = vadd.s32 104, %v1403_v2  ;;  %p1051_p8 = por %p1050_p9, %p1049_p10 }
  0x99   : > { %v536_v7 = vsel %vm504_vm15, %v408_v57, 0  ;;  %vm393_vm0 = vcmp.lt.s32.totalorder %v361_v61, 1200  ;;  %v345_v9 = vadd.s32 %v313_v62, %v1407_v4  ;;  %v331_v10 = vadd.s32 240, %v1403_v2 }
  0x9a   : > { %872 = vmatprep.subr.bf16.mxu0 %v849_v63  ;;  %v841_v11 = vcombine.low %v535_v0, %v536_v7  ;;  %vm394_vm1 = vcmp.lt.s32.totalorder %v362_v1, 1200  ;;  %vm1581_vm2 = vmpackc.low %vm393_vm0, %vm393_vm0  ;;  %v346_v13 = vadd.s32 %v314_v6, %v1407_v4  ;;  %v332_v15 = vadd.s32 248, %v1403_v2  ;;  %p1052_p13 = pnand %p1051_p8, %p1045_p7 }
  0x9b   : > { %vm522_vm3 = vmpackc.low %vm394_vm1, %vm394_vm1  ;;  %v553_v16 = vsel %vm1581_vm2, %v425_v5, 0  ;;  %vm377_vm4 = vcmp.lt.s32.totalorder %v345_v9, 1200  ;;  %v363_v18 = vadd.s32 %v331_v10, %v1407_v4  ;;  %v315_v19 = vadd.s32 112, %v1403_v2 }
  0x9c   : > { %873 = vmatpush3.bf16.msra.mxu0 %v841_v11  ;;  %v554_v20 = vsel %vm522_vm3, %v426_v8, 0  ;;  %vm378_vm5 = vcmp.lt.s32.totalorder %v346_v13, 1200  ;;  %vm1593_vm6 = vmpackc.low %vm377_vm4, %vm377_vm4  ;;  %v364_v22 = vadd.s32 %v332_v15, %v1407_v4  ;;  %v316_v24 = vadd.s32 120, %v1403_v2 }
  0x9d   : > { %v850_v25 = vcombine.low %v553_v16, %v554_v20  ;;  %vm506_vm7 = vmpackc.low %vm378_vm5, %vm378_vm5  ;;  %v537_v26 = vsel %vm1593_vm6, %v409_v14, 0  ;;  %vm395_vm8 = vcmp.lt.s32.totalorder %v363_v18, 1200  ;;  %v347_v28 = vadd.s32 %v315_v19, %v1407_v4 }
  0x9e   : > { %v538_v30 = vsel %vm506_vm7, %v410_v17, 0  ;;  %vm396_vm9 = vcmp.lt.s32.totalorder %v364_v22, 1200  ;;  %vm1605_vm10 = vmpackc.low %vm395_vm8, %vm395_vm8  ;;  %v348_v32 = vadd.s32 %v316_v24, %v1407_v4  ;;  %v267_v33 = vadd.s32 128, %v1405_v3 }
  0x9f   : > { %874 = vmatprep.subr.bf16.mxu0 %v850_v25  ;;  %v842_v35 = vcombine.low %v537_v26, %v538_v30  ;;  %vm524_vm11 = vmpackc.low %vm396_vm9, %vm396_vm9  ;;  %v555_v36 = vsel %vm1605_vm10, %v427_v23, 0  ;;  %vm379_vm12 = vcmp.lt.s32.totalorder %v347_v28, 1200  ;;  %v276_v38 = vsub.s32 0, %v1403_v2 }
  0xa0   : > { %v556_v39 = vsel %vm524_vm11, %v428_v27, 0  ;;  %vm380_vm13 = vcmp.lt.s32.totalorder %v348_v32, 1200  ;;  %vm507_vm14 = vmpackc.low %vm379_vm12, %vm379_vm12  ;;  %v270_v40 = vadd.s32 %v1407_v4, %v267_v33  ;;  %v280_v41 = vsub.s32 1, %v1403_v2 }
  0xa1   : > { %875 = vmatpush3.bf16.msra.mxu0 %v842_v35  ;;  %v851_v42 = vcombine.low %v555_v36, %v556_v39  ;;  %vm508_vm15 = vmpackc.low %vm380_vm13, %vm380_vm13  ;;  %v539_v43 = vsel %vm507_vm14, %v411_v29, 0  ;;  %v277_v44 = vrot.slane %v273_v34, %v276_v38  ;;  %v269_v47 = vadd.s32 %v1407_v4, %v1405_v3  ;;  %v557_v4 = vld [vmem:[%s1397_s21] sm:$0xff] }
  0xa2   : > { %v540_v45 = vsel %vm508_vm15, %v412_v37, 0  ;;  %vm272_vm0 = vcmp.lt.s32.totalorder %v270_v40, 1200  ;;  %v281_v46 = vrot.slane %v273_v34, %v280_v41  ;;  %v1175_v53 = vmov 1.0|1.0  }
  0xa3   : > { %876 = vmatprep.subr.bf16.mxu0 %v851_v42  ;;  %v843_v48 = vcombine.low %v539_v43, %v540_v45  ;;  %vm271_vm1 = vcmp.lt.s32.totalorder %v269_v47, 1200 }
  0xa4   : > { %v283_v49 = vsel %vm272_vm0, %v281_v46, 4294967295  ;;  %v282_v51 = vsel %vm271_vm1, %v277_v44, 4294967295 }
  0xa5   : > { %877 = vmatpush3.bf16.msra.mxu0 %v843_v48  ;;  %v293_v50 = vrot.slane %v283_v49, %v276_v38  ;;  %v289_v52 = vrot.slane %v282_v51, %v276_v38 }
  0xa7   : > { %vm295_vm2 = vcmp.eq.s32.totalorder %v1403_v2, %v293_v50  ;;  %vm294_vm4 = vcmp.eq.s32.totalorder %v1403_v2, %v289_v52 }
  0xa8   : > { %vm852_vm3 = vmpackc.low %vm295_vm2, %vm295_vm2 }
  0xa9   : > { %853 = vmatprep.mubr.msk.bf16.mxu0 %vm852_vm3, %v1175_v53  ;;  %vm854_vm5 = vmpackc.low %vm294_vm4, %vm294_vm4 }
  0xaa   : > { %855 = vmatmul.mubr.msk.bf16.vlgmr.msra.gmra.mrb[0].mxu0 %vm854_vm5, %v1175_v53 }
 0x17d   : > { %v878_v3 = vpop.f32.mrb[0].mxu0 }
 0x17e   : > { %v879_v54 = vpop.f32.mrb[1].mxu0 }
 0x17f   : > { %v880_v55 = vadd.f32 %v879_v54, %v878_v3  ;;  %v881_v56 = vpop.f32.mrb[2].mxu0 }
 0x180   : > { %v882_v57 = vpop.f32.mrb[3].mxu0 }
 0x181   : > { %v694_v58 = vadd.f32 %v880_v55, %v557_v4 }
 0x183   : > { %695 = vst [vmem:[%s1397_s21] sm:$0xff] %v694_v58 }
 0x184   : > { %1055 = shalt.err (!%p1052_p13)
}
 0x185   : > { %s1056_s24 = scalar_lea.hbm %s1628_s22, 128  ;;  %s1060_s30 = scalar_lea.hbm %s1695_s2, 256 }
 0x186   : > { %p1057_p11 = scmp.ne.s32.totalorder %s1628_s22, %s1056_s24  ;;  %p1061_p0 = scmp.lt.u32.totalorder %s1628_s22, %s1695_s2 }
 0x187   : > { %p1062_p1 = scmp.lt.u32.totalorder %s1060_s30, %s1056_s24  ;;  %p1064_p2 = scmp.lt.u32.totalorder %s1056_s24, %s1628_s22 }
 0x188   : > { %p1058_p3 = pnand %p1057_p11, %p1743_p4 }
 0x189   : > { %p1063_p5 = por %p1062_p1, %p1061_p0 }
 0x18a   : > { %p1059_p12 = pneg %p1058_p3 }
 0x18b   : > { %p1065_p6 = por %p1064_p2, %p1063_p5 }
 0x18d   : > { %p1066_p7 = pnand %p1065_p6, %p1059_p12 }
 0x18f   : > { %1069 = shalt.err (!%p1066_p7)
}
 0x190   : > { %887 = dma.vmem_to_hbm [thread:$0]  (%p1743_p4), %s1630_s3, 128, %s1628_s22, %s697_s26  }
 0x191 PF: > { %p893_p10 = scmp.ge.s32.totalorder %s1168_s19, 2  ;;  %s722_s4 = sand.u32 1, %s1128_s9  }
 0x192   : > { %p1744_p9 = scmp.ne.s32.totalorder %s1710_s12, 0  ;;  %s723_s29 = scalar_lea.sflag [#allocation4], %s722_s4 }
 0x194   : > { %p890_p8 = pnand %p893_p10, %p1744_p9 }
 0x196   : > { %1123 = dma.done.wait (!%p890_p8), %s723_s29, 128  }
 0x197   : > { %1125 = vsyncadd (!%p890_p8), %s723_s29, 4294967168  ;;  %s21_s19 = sadd.s32 1, %s1168_s19   ;;  %s1745_s15 = sld [smem:[#allocation11_spill]] }
 0x198   : > { %p18_p13 = scmp.ge.s32.totalorder %s21_s19, 8   ;;  %s1746_s16 = sld [smem:[#allocation12_spill]] }
 0x199   : > { %s1747_s17 = sld [smem:[#allocation13_spill]]  ;;  %s1748_s18 = sld [smem:[#allocation14_spill]] }
 0x19a   : > { %s1749_s9 = smov %s1132_s10  ;;  %s1750_s10 = smov %s1136_s11 }
 0x19b   : > { %s1751_s11 = smov %s1282_s5  ;;  %s1752_s12 = smov %s1144_s13 }
 0x19c   : > { %s1753_s13 = smov %s1148_s14  ;;  %s1754_s14 = smov %s1296_s8 }
 0x19d   :  { %20 = sbr.rel (!%p18_p13) target bundleno = 11 (0xb), region = 90 }
 0x1a4   :  { %728 = vsyncpa [#allocation3], 1 }
 0x1a5   :  { %730 = vsyncpa [#allocation3 + $0x1], 1 }
 0x1a6   :  { %731 = vsyncpa [#allocation6], 1 }
 0x1a7   :  { %733 = vsyncpa [#allocation6 + $0x1], 1 }
 0x1a8   :  { %734 = vsyncpa [#allocation4], 1 }
 0x1a9   :  { %736 = vsyncpa [#allocation4 + $0x1], 1 }

</bundles_post_ra>
